<compile_context>
chip_gen: v7x
topology: tpu7x:2x2x1
jax: 0.10.0
libtpu: 0.0.40
codegen_flags: <defaults>
</compile_context>

<pallas_src>
import functools

import jax
import jax.numpy as jnp
from jax import lax
from jax.experimental import pallas as pl
from jax.experimental.pallas import tpu as pltpu

NODATA = -9999.0
IDX_VAR = (10, 12)

LANES = 128      # TPU vreg lane width
SUBLANES = 8     # TPU vreg sublane count


def _round_up(x, m):
    return ((x + m - 1) // m) * m


def _num_tensorcores():
    """2 TensorCores per chip on megacore-style parts (v4/v5p) and v7x, else 1."""
    try:
        kind = jax.devices()[0].device_kind.lower()
    except Exception:
        return 1
    if any(tag in kind for tag in ("v4", "v5p", "v7", "7x")):
        return 2
    return 1


def _masked_sq_cnt_kernel(x_ref, t_ref, sq_ref, cnt_ref, *,
                          nodata, valid_elems, tile_r, steps_per_core):
    """Accumulate per-lane sum((x-t)^2) and valid counts over one (tile_r,128) slab.

    sq_ref / cnt_ref are (8, 128) per-lane accumulators held resident in VMEM
    across the 'arbitrary' reduction axis (one accumulator block per core row).
    """
    p = pl.program_id(0)
    i = pl.program_id(1)

    @pl.when(i == 0)
    def _():
        sq_ref[...] = jnp.zeros_like(sq_ref)
        cnt_ref[...] = jnp.zeros_like(cnt_ref)

    def accumulate(extra_valid):
        x = x_ref[...].astype(jnp.float32)
        t = t_ref[...].astype(jnp.float32)
        valid = t != jnp.float32(nodata)
        if extra_valid is not None:
            valid = jnp.logical_and(valid, extra_valid)
        diff = jnp.where(valid, x - t, jnp.float32(0.0))
        d2 = diff * diff
        cnt = valid.astype(jnp.float32)
        # Layout-preserving reshape -> sublane-group accumulation with
        # full-width VPU adds only (no per-step cross-lane XLU reduce).
        sq_ref[...] += jnp.sum(d2.reshape(tile_r // SUBLANES, SUBLANES, LANES), axis=0)
        cnt_ref[...] += jnp.sum(cnt.reshape(tile_r // SUBLANES, SUBLANES, LANES), axis=0)

    tile_elems = tile_r * LANES
    gbi = p * steps_per_core + i                       # global block index (unclamped)
    boundary = (gbi + 1) * tile_elems > valid_elems    # tile touches pad/ragged region

    @pl.when(jnp.logical_not(boundary))
    def _():
        accumulate(None)                               # hot path: no iota, no mask

    @pl.when(boundary)
    def _():
        base = gbi * tile_elems
        row = lax.broadcasted_iota(jnp.int32, (tile_r, LANES), 0)
        lane = lax.broadcasted_iota(jnp.int32, (tile_r, LANES), 1)
        g = base + row * LANES + lane
        accumulate(g < valid_elems)


def masked_mse_selected_vars_loss(inp, target, idx_var=IDX_VAR, nodata=NODATA,
                                  weight_var=None, tile_r_max=2048, num_cores=None):
    """Forward pass of MaskedMSESelectedVarsLoss (b_annual=True)."""
    B, T, V = inp.shape
    K = len(idx_var)
    assert target.shape == (B, T, K)
    assert max(idx_var) < V
    # Lane-interleaved variable split requires K | 128.
    # TODO(synk): general K (128 % K != 0) would need a per-variable lane mask.
    assert LANES % K == 0
    if weight_var is None:
        weight_var = (1.0,) * K
    assert len(weight_var) == K

    # agg_dbh_d13c as a single gather along the variable axis: (B, T, K), same
    # memory order as `target` (no transpose / stack, no touching unused vars).
    sel = jnp.take(inp, jnp.asarray(idx_var, dtype=jnp.int32), axis=-1)

    M = B * T * K                                   # valid elements
    M_pad = _round_up(M, SUBLANES * LANES)          # <= 1023-element tail pad
    x_flat = sel.reshape(-1)
    t_flat = target.reshape(-1)
    if M_pad != M:
        # Pad value is irrelevant: boundary tiles are masked by global index.
        x_flat = jnp.pad(x_flat, (0, M_pad - M))
        t_flat = jnp.pad(t_flat, (0, M_pad - M))
    R = M_pad // LANES                              # lane-dense rows, multiple of 8
    x2 = x_flat.reshape(R, LANES)
    t2 = t_flat.reshape(R, LANES)

    # Tile / core selection clamped to the problem size.
    nc = _num_tensorcores() if num_cores is None else int(num_cores)
    nc = max(1, nc)
    tile_r = min(int(tile_r_max), _round_up(pl.cdiv(R, nc), SUBLANES))
    total_blocks = pl.cdiv(R, tile_r)
    nc = max(1, min(nc, total_blocks))              # never stream pure padding
    steps_per_core = pl.cdiv(total_blocks, nc)

    # Ragged last block (and the at-most-one duplicated block when nc does not
    # divide total_blocks) is neutralized by the in-kernel global-index mask;
    # the index_map clamp keeps every DMA in bounds.
    def in_index_map(p, i):
        return (jnp.minimum(p * steps_per_core + i, total_blocks - 1), 0)

    kernel = functools.partial(
        _masked_sq_cnt_kernel, nodata=float(nodata), valid_elems=M,
        tile_r=tile_r, steps_per_core=steps_per_core)

    block_bytes = tile_r * LANES * 4
    vmem_limit = int(min(48 << 20, max(32 << 20, 16 * block_bytes)))

    sq, cnt = pl.pallas_call(
        kernel,
        out_shape=(
            jax.ShapeDtypeStruct((nc * SUBLANES, LANES), jnp.float32),
            jax.ShapeDtypeStruct((nc * SUBLANES, LANES), jnp.float32),
        ),
        grid_spec=pltpu.PrefetchScalarGridSpec(
            num_scalar_prefetch=0,
            grid=(nc, steps_per_core),
            in_specs=[
                pl.BlockSpec((tile_r, LANES), in_index_map),
                pl.BlockSpec((tile_r, LANES), in_index_map),
            ],
            out_specs=(
                pl.BlockSpec((SUBLANES, LANES), lambda p, i: (p, 0)),
                pl.BlockSpec((SUBLANES, LANES), lambda p, i: (p, 0)),
            )),
        compiler_params=pltpu.CompilerParams(
            dimension_semantics=("parallel", "arbitrary"),
            vmem_limit_bytes=vmem_limit),
    )(x2, t2)

    # Tiny final reduce: lane l accumulated variable (l % K) because variables
    # interleave along the flat element axis and K divides 128.
    w = jnp.asarray(weight_var, jnp.float32)
    sq_var = sq.reshape(-1, LANES // K, K).sum(axis=(0, 1))     # (K,)
    cnt_var = cnt.reshape(-1, LANES // K, K).sum(axis=(0, 1))   # (K,)
    # TODO(synk): 0/0 -> NaN when a variable has zero valid entries, matching
    # the PyTorch reference (mean over an empty selection).
    return jnp.sum(w * sq_var / cnt_var)


def reference_loss(inp, target, idx_var=IDX_VAR, nodata=NODATA, weight_var=None):
    """Pure-JAX reference matching the PyTorch module semantics."""
    K = len(idx_var)
    if weight_var is None:
        weight_var = (1.0,) * K
    loss = jnp.float32(0.0)
    for i, j in enumerate(idx_var):
        sel = inp[..., j].astype(jnp.float32)
        tgt = target[..., i].astype(jnp.float32)
        mask = tgt != nodata
        diff = jnp.where(mask, sel - tgt, 0.0)
        loss += (jnp.sum(diff * diff) /
                 jnp.sum(mask.astype(jnp.float32))) * weight_var[i]
    return loss


if __name__ == "__main__":
    key = jax.random.PRNGKey(0)
    k1, k2, k3 = jax.random.split(key, 3)

    B, T, V, K = 2, 16, 13, 2   # small shapes: batch=2, months=16, 13 3-PG state vars

    inp = jax.random.normal(k1, (B, T, V), dtype=jnp.float32)

    # Target = selected vars + noise, with ~30% of entries set to nodata.
    sel = jnp.stack([inp[..., IDX_VAR[0]], inp[..., IDX_VAR[1]]], axis=-1)
    noise = 0.1 * jax.random.normal(k2, (B, T, K), dtype=jnp.float32)
    drop = jax.random.uniform(k3, (B, T, K)) < 0.3
    target = jnp.where(drop, jnp.float32(NODATA), sel + noise)

    loss = jax.block_until_ready(masked_mse_selected_vars_loss(inp, target))
    ref = jax.block_until_ready(reference_loss(inp, target))

    assert jnp.allclose(loss, ref, rtol=1e-5, atol=1e-5), (loss, ref)
    print("KERNEL_OK")
</pallas_src>

<mosaic_0001>
module attributes {stable_mosaic.version = 11 : i64} {
  func.func @_masked_sq_cnt_kernel(%arg0: i32, %arg1: i32, %arg2: memref<8x128xf32, #tpu.memory_space<vmem>>, %arg3: memref<8x128xf32, #tpu.memory_space<vmem>>, %arg4: memref<8x128xf32, #tpu.memory_space<vmem>>, %arg5: memref<8x128xf32, #tpu.memory_space<vmem>>) attributes {dimension_semantics = [#tpu.dimension_semantics<parallel>, #tpu.dimension_semantics<arbitrary>], iteration_bounds = array<i64: 1, 1>, scalar_prefetch = 0 : i64, scratch_operands = 0 : i64, tpu.core_type = #tpu.core_type<tc>, window_params = [{transform_indices = @transform_0, window_bounds = array<i64: 8, 128>}, {transform_indices = @transform_1, window_bounds = array<i64: 8, 128>}, {transform_indices = @transform_2, window_bounds = array<i64: 8, 128>}, {transform_indices = @transform_3, window_bounds = array<i64: 8, 128>}]} {
    %c0_i32 = arith.constant 0 : i32
    %0 = arith.cmpi eq, %arg1, %c0_i32 : i32
    %1 = arith.extui %0 : i1 to i32
    %c0_i32_0 = arith.constant 0 : i32
    %2 = arith.cmpi ne, %1, %c0_i32_0 : i32
    scf.if %2 {
      %cst = arith.constant 0.000000e+00 : f32
      %13 = vector.broadcast %cst : f32 to vector<8x128xf32>
      %c0 = arith.constant 0 : index
      %c0_4 = arith.constant 0 : index
      %14 = vector.load %arg4[%c0, %c0_4] : memref<8x128xf32, #tpu.memory_space<vmem>>, vector<8x128xf32>
      tpu.vector_store %arg4[%c0, %c0_4], %13 {strides = array<i32>} : memref<8x128xf32, #tpu.memory_space<vmem>>, vector<8x128xf32>,
      %cst_5 = arith.constant 0.000000e+00 : f32
      %15 = vector.broadcast %cst_5 : f32 to vector<8x128xf32>
      %c0_6 = arith.constant 0 : index
      %c0_7 = arith.constant 0 : index
      %16 = vector.load %arg5[%c0_6, %c0_7] : memref<8x128xf32, #tpu.memory_space<vmem>>, vector<8x128xf32>
      tpu.vector_store %arg5[%c0_6, %c0_7], %15 {strides = array<i32>} : memref<8x128xf32, #tpu.memory_space<vmem>>, vector<8x128xf32>,
    } else {
    }
    %c1_i32 = arith.constant 1 : i32
    %3 = arith.muli %arg0, %c1_i32 : i32
    %4 = arith.addi %3, %arg1 : i32
    %c1_i32_1 = arith.constant 1 : i32
    %5 = arith.addi %4, %c1_i32_1 : i32
    %c1024_i32 = arith.constant 1024 : i32
    %6 = arith.muli %5, %c1024_i32 : i32
    %c64_i32 = arith.constant 64 : i32
    %7 = arith.cmpi sgt, %6, %c64_i32 : i32
    %true = arith.constant true
    %8 = arith.xori %7, %true : i1
    %9 = arith.extui %8 : i1 to i32
    %c0_i32_2 = arith.constant 0 : i32
    %10 = arith.cmpi ne, %9, %c0_i32_2 : i32
    scf.if %10 {
      %c0 = arith.constant 0 : index
      %c0_4 = arith.constant 0 : index
      %13 = vector.load %arg2[%c0, %c0_4] : memref<8x128xf32, #tpu.memory_space<vmem>>, vector<8x128xf32>
      %c0_5 = arith.constant 0 : index
      %c0_6 = arith.constant 0 : index
      %14 = vector.load %arg3[%c0_5, %c0_6] : memref<8x128xf32, #tpu.memory_space<vmem>>, vector<8x128xf32>
      %cst = arith.constant -9.999000e+03 : f32
      %15 = vector.broadcast %cst : f32 to vector<8x128xf32>
      %16 = arith.cmpf one, %14, %15 : vector<8x128xf32>
      %17 = arith.subf %13, %14 : vector<8x128xf32>
      %cst_7 = arith.constant 0.000000e+00 : f32
      %18 = vector.broadcast %cst_7 : f32 to vector<8x128xf32>
      %19 = arith.select %16, %17, %18 : vector<8x128xi1>, vector<8x128xf32>
      %20 = arith.mulf %19, %19 : vector<8x128xf32>
      %21 = arith.extui %16 : vector<8x128xi1> to vector<8x128xi32>
      %22 = arith.sitofp %21 : vector<8x128xi32> to vector<8x128xf32>
      %c0_8 = arith.constant 0 : index
      %c0_9 = arith.constant 0 : index
      %23 = vector.load %arg4[%c0_8, %c0_9] : memref<8x128xf32, #tpu.memory_space<vmem>>, vector<8x128xf32>
      %24 = vector.shape_cast %20 : vector<8x128xf32> to vector<1x8x128xf32>
      %cst_10 = arith.constant dense<0.000000e+00> : vector<8x128xf32>
      %25 = vector.multi_reduction <add>, %24, %cst_10 [0] : vector<1x8x128xf32> to vector<8x128xf32>
      %26 = arith.addf %23, %25 : vector<8x128xf32>
      %c0_11 = arith.constant 0 : index
      %c0_12 = arith.constant 0 : index
      %27 = vector.load %arg4[%c0_11, %c0_12] : memref<8x128xf32, #tpu.memory_space<vmem>>, vector<8x128xf32>
      tpu.vector_store %arg4[%c0_11, %c0_12], %26 {strides = array<i32>} : memref<8x128xf32, #tpu.memory_space<vmem>>, vector<8x128xf32>,
      %c0_13 = arith.constant 0 : index
      %c0_14 = arith.constant 0 : index
      %28 = vector.load %arg5[%c0_13, %c0_14] : memref<8x128xf32, #tpu.memory_space<vmem>>, vector<8x128xf32>
      %29 = vector.shape_cast %22 : vector<8x128xf32> to vector<1x8x128xf32>
      %cst_15 = arith.constant dense<0.000000e+00> : vector<8x128xf32>
      %30 = vector.multi_reduction <add>, %29, %cst_15 [0] : vector<1x8x128xf32> to vector<8x128xf32>
      %31 = arith.addf %28, %30 : vector<8x128xf32>
      %c0_16 = arith.constant 0 : index
      %c0_17 = arith.constant 0 : index
      %32 = vector.load %arg5[%c0_16, %c0_17] : memref<8x128xf32, #tpu.memory_space<vmem>>, vector<8x128xf32>
      tpu.vector_store %arg5[%c0_16, %c0_17], %31 {strides = array<i32>} : memref<8x128xf32, #tpu.memory_space<vmem>>, vector<8x128xf32>,
    } else {
    }
    %11 = arith.extui %7 : i1 to i32
    %c0_i32_3 = arith.constant 0 : i32
    %12 = arith.cmpi ne, %11, %c0_i32_3 : i32
    scf.if %12 {
      %c1024_i32_4 = arith.constant 1024 : i32
      %13 = arith.muli %4, %c1024_i32_4 : i32
      %14 = tpu.iota {dimensions = array<i32: 0>} : vector<8x128xi32>
      %15 = tpu.iota {dimensions = array<i32: 1>} : vector<8x128xi32>
      %c128_i32 = arith.constant 128 : i32
      %16 = vector.broadcast %c128_i32 : i32 to vector<8x128xi32>
      %17 = arith.muli %14, %16 : vector<8x128xi32>
      %18 = vector.broadcast %13 : i32 to vector<8x128xi32>
      %19 = arith.addi %18, %17 : vector<8x128xi32>
      %20 = arith.addi %19, %15 : vector<8x128xi32>
      %c64_i32_5 = arith.constant 64 : i32
      %21 = vector.broadcast %c64_i32_5 : i32 to vector<8x128xi32>
      %22 = arith.cmpi slt, %20, %21 : vector<8x128xi32>
      %c0 = arith.constant 0 : index
      %c0_6 = arith.constant 0 : index
      %23 = vector.load %arg2[%c0, %c0_6] : memref<8x128xf32, #tpu.memory_space<vmem>>, vector<8x128xf32>
      %c0_7 = arith.constant 0 : index
      %c0_8 = arith.constant 0 : index
      %24 = vector.load %arg3[%c0_7, %c0_8] : memref<8x128xf32, #tpu.memory_space<vmem>>, vector<8x128xf32>
      %cst = arith.constant -9.999000e+03 : f32
      %25 = vector.broadcast %cst : f32 to vector<8x128xf32>
      %26 = arith.cmpf one, %24, %25 : vector<8x128xf32>
      %27 = arith.andi %26, %22 : vector<8x128xi1>
      %28 = arith.subf %23, %24 : vector<8x128xf32>
      %cst_9 = arith.constant 0.000000e+00 : f32
      %29 = vector.broadcast %cst_9 : f32 to vector<8x128xf32>
      %30 = arith.select %27, %28, %29 : vector<8x128xi1>, vector<8x128xf32>
      %31 = arith.mulf %30, %30 : vector<8x128xf32>
      %32 = arith.extui %27 : vector<8x128xi1> to vector<8x128xi32>
      %33 = arith.sitofp %32 : vector<8x128xi32> to vector<8x128xf32>
      %c0_10 = arith.constant 0 : index
      %c0_11 = arith.constant 0 : index
      %34 = vector.load %arg4[%c0_10, %c0_11] : memref<8x128xf32, #tpu.memory_space<vmem>>, vector<8x128xf32>
      %35 = vector.shape_cast %31 : vector<8x128xf32> to vector<1x8x128xf32>
      %cst_12 = arith.constant dense<0.000000e+00> : vector<8x128xf32>
      %36 = vector.multi_reduction <add>, %35, %cst_12 [0] : vector<1x8x128xf32> to vector<8x128xf32>
      %37 = arith.addf %34, %36 : vector<8x128xf32>
      %c0_13 = arith.constant 0 : index
      %c0_14 = arith.constant 0 : index
      %38 = vector.load %arg4[%c0_13, %c0_14] : memref<8x128xf32, #tpu.memory_space<vmem>>, vector<8x128xf32>
      tpu.vector_store %arg4[%c0_13, %c0_14], %37 {strides = array<i32>} : memref<8x128xf32, #tpu.memory_space<vmem>>, vector<8x128xf32>,
      %c0_15 = arith.constant 0 : index
      %c0_16 = arith.constant 0 : index
      %39 = vector.load %arg5[%c0_15, %c0_16] : memref<8x128xf32, #tpu.memory_space<vmem>>, vector<8x128xf32>
      %40 = vector.shape_cast %33 : vector<8x128xf32> to vector<1x8x128xf32>
      %cst_17 = arith.constant dense<0.000000e+00> : vector<8x128xf32>
      %41 = vector.multi_reduction <add>, %40, %cst_17 [0] : vector<1x8x128xf32> to vector<8x128xf32>
      %42 = arith.addf %39, %41 : vector<8x128xf32>
      %c0_18 = arith.constant 0 : index
      %c0_19 = arith.constant 0 : index
      %43 = vector.load %arg5[%c0_18, %c0_19] : memref<8x128xf32, #tpu.memory_space<vmem>>, vector<8x128xf32>
      tpu.vector_store %arg5[%c0_18, %c0_19], %42 {strides = array<i32>} : memref<8x128xf32, #tpu.memory_space<vmem>>, vector<8x128xf32>,
    } else {
    }
    return
  }
  func.func @transform_0(%arg0: i32, %arg1: i32) -> (i32, i32) {
    %c1_i32 = arith.constant 1 : i32
    %0 = arith.muli %arg0, %c1_i32 : i32
    %1 = arith.addi %0, %arg1 : i32
    %c0_i32 = arith.constant 0 : i32
    %2 = arith.minsi %1, %c0_i32 : i32
    %c0_i32_0 = arith.constant 0 : i32
    %c0_i32_1 = arith.constant 0 : i32
    return %2, %c0_i32_0 : i32, i32
  }
  func.func @transform_1(%arg0: i32, %arg1: i32) -> (i32, i32) {
    %c1_i32 = arith.constant 1 : i32
    %0 = arith.muli %arg0, %c1_i32 : i32
    %1 = arith.addi %0, %arg1 : i32
    %c0_i32 = arith.constant 0 : i32
    %2 = arith.minsi %1, %c0_i32 : i32
    %c0_i32_0 = arith.constant 0 : i32
    %c0_i32_1 = arith.constant 0 : i32
    return %2, %c0_i32_0 : i32, i32
  }
  func.func @transform_2(%arg0: i32, %arg1: i32) -> (i32, i32) {
    %c0_i32 = arith.constant 0 : i32
    %c0_i32_0 = arith.constant 0 : i32
    return %arg0, %c0_i32 : i32, i32
  }
  func.func @transform_3(%arg0: i32, %arg1: i32) -> (i32, i32) {
    %c0_i32 = arith.constant 0 : i32
    %c0_i32_0 = arith.constant 0 : i32
    return %arg0, %c0_i32 : i32, i32
  }
}

</mosaic_0001>

<bundles_post_ra>
// kernel: tpu_custom_call.1
= control target key start
LH: loop header
LB: loop body
LE: loop exit
PB: predicated region body
PF: predicated region fallthrough
CT: control target
= control target key end

     0   :  { %9 = vsyncpa [#allocation3], 0  ;;  %s325_s0 = inlined_call_operand.hbm [shape: f32[8,128], index: 0, kind: input, shape index: {}]   ;;  %s326_s1 = inlined_call_operand.hbm [shape: f32[8,128], index: 1, kind: input, shape index: {}]   ;;  %s327_s2 = inlined_call_operand.hbm [shape: f32[8,128], index: 2, kind: output, shape index: {0}]   ;;  %s328_s3 = inlined_call_operand.hbm [shape: f32[8,128], index: 3, kind: output, shape index: {1}]  }
   0x1   :  { %10 = vsyncpa [#allocation6], 0 }
   0x2   :  { %11 = vsyncpa [#allocation4], 0 }
   0x3   :  { %12 = vsyncpa [#allocation9], 0  ;;  %s252_s12 = smov [#allocation2]   ;;  %s253_s14 = smov [#allocation5]  }
   0x4   :  { %s24_s13 = sshll.u32 %s252_s12, 4  ;;  %s39_s15 = sshll.u32 %s253_s14, 4  ;;  %s25_s13 = int_to_ptr.vmem [resolvable:$true] %s24_s13  ;;  %s40_s15 = int_to_ptr.vmem [resolvable:$true] %s39_s15 }
   0x5   :  { %s156_s18 = scalar_lea.hbm %s325_s0, 128 }
   0x6   :  { %p157_p0 = scmp.ne.s32.totalorder %s325_s0, %s156_s18  ;;  %p160_p1 = scmp.lt.u32.totalorder %s156_s18, %s325_s0 }
   0x8   :  { %p162_p2 = pnand %p160_p1, %p157_p0 }
   0xa   :  { %165 = shalt.err (!%p162_p2)
}
   0xb   :  { %s166_s23 = scalar_lea.vmem %s25_s13, 128  ;;  %p171_p4 = scmp.lt.s32.totalorder %s25_s13, %s25_s13 }
   0xc   :  { %p167_p3 = scmp.ne.s32.totalorder %s25_s13, %s166_s23  ;;  %p172_p5 = scmp.lt.s32.totalorder %s166_s23, %s166_s23 }
   0xe   :  { %p173_p6 = por %p172_p5, %p171_p4 }
  0x10   :  { %p174_p7 = pnand %p173_p6, %p167_p3 }
  0x12   :  { %177 = shalt.err (!%p174_p7)
}
  0x13   :  { %27 = dma.hbm_to_vmem [thread:$0]  %s325_s0, 128, %s25_s13, [#allocation3]  }
  0x14   :  { %s178_s28 = scalar_lea.hbm %s326_s1, 128 }
  0x15   :  { %p179_p8 = scmp.ne.s32.totalorder %s326_s1, %s178_s28  ;;  %p182_p9 = scmp.lt.u32.totalorder %s178_s28, %s326_s1 }
  0x17   :  { %p184_p10 = pnand %p182_p9, %p179_p8 }
  0x19   :  { %187 = shalt.err (!%p184_p10)
}
  0x1a   :  { %s188_s6 = scalar_lea.vmem %s40_s15, 128  ;;  %p193_p12 = scmp.lt.s32.totalorder %s40_s15, %s40_s15 }
  0x1b   :  { %p189_p11 = scmp.ne.s32.totalorder %s40_s15, %s188_s6  ;;  %p194_p13 = scmp.lt.s32.totalorder %s188_s6, %s188_s6 }
  0x1d   :  { %p195_p0 = por %p194_p13, %p193_p12 }
  0x1f   :  { %p196_p1 = pnand %p195_p0, %p189_p11 }
  0x21   :  { %199 = shalt.err (!%p196_p1)
}
  0x22   :  { %42 = dma.hbm_to_vmem [thread:$0]  %s326_s1, 128, %s40_s15, [#allocation6]  }
  0x23   :  { %244 = dma.done.wait [#allocation3], 128  }
  0x24   :  { %245 = vsyncadd [#allocation3], 4294967168 }
  0x25   :  { %246 = dma.done.wait [#allocation6], 128  }
  0x26   :  { %247 = vsyncadd [#allocation6], 4294967168  ;;  %v89_v0 = vlaneseq  ;;  %v98_v5 = vld [vmem:[#allocation2] sm:$0xff]  ;;  %v99_v6 = vld [vmem:[#allocation5] sm:$0xff]  ;;  %s254_s8 = smov [#allocation8]   ;;  %v255_v9 = vmov 0.0  }
  0x27   :  { %vm100_vm1 = vcmp.ne.f32.partialorder %v99_v6, -9999.0  ;;  %v102_v7 = vsub.f32 %v98_v5, %v99_v6  ;;  %s131_s9 = sshll.u32 %s254_s8, 4  ;;  %s256_s1 = smov [#allocation7]   ;;  %s132_s9 = int_to_ptr.vmem [resolvable:$true] %s131_s9 }
  0x28   :  { %v90_v1 = vshrl.u32 %v89_v0, 7  ;;  %v92_v2 = vand.u32 127, %v89_v0  ;;  %s121_s10 = sshll.u32 %s256_s1, 4  ;;  %s200_s11 = scalar_lea.vmem %s132_s9, 128  ;;  %s122_s10 = int_to_ptr.vmem [resolvable:$true] %s121_s10 }
  0x29   :  { %p201_p2 = scmp.ne.s32.totalorder %s132_s9, %s200_s11  ;;  %p205_p3 = scmp.lt.s32.totalorder %s132_s9, %s132_s9 }
  0x2a   :  { %v93_v3 = vmul.u32 128, %v90_v1  ;;  %p206_p4 = scmp.lt.s32.totalorder %s200_s11, %s200_s11 }
  0x2c   :  { %v96_v4 = vadd.s32 %v93_v3, %v92_v2  ;;  %p207_p5 = por %p206_p4, %p205_p3 }
  0x2e   :  { %vm97_vm0 = vcmp.lt.s32.totalorder %v96_v4, 64  ;;  %p208_p6 = pnand %p207_p5, %p201_p2 }
  0x2f   :  { %vm101_vm2 = vmand %vm100_vm1, %vm97_vm0 }
  0x30   :  { %v103_v8 = vsel %vm101_vm2, %v102_v7, 0.0  ;;  %v150_v10 = vsel %vm101_vm2, 1.0, %v255_v9 }
  0x31   :  { %v104_v11 = vmul.f32 %v103_v8, %v103_v8  ;;  %114 = vst [vmem:[#allocation8] sm:$0xff] %v150_v10 }
  0x32   :  { %211 = shalt.err (!%p208_p6)
}
  0x33   :  { %s212_s14 = scalar_lea.hbm %s328_s3, 128 }
  0x34   :  { %p213_p7 = scmp.ne.s32.totalorder %s328_s3, %s212_s14  ;;  %p216_p8 = scmp.lt.u32.totalorder %s212_s14, %s328_s3 }
  0x36   :  { %p218_p9 = pnand %p216_p8, %p213_p7 }
  0x38   :  { %221 = shalt.err (!%p218_p9)
}
  0x39   :  { %134 = dma.vmem_to_hbm [thread:$0]  %s132_s9, 128, %s328_s3, [#allocation9]   ;;  %110 = vst [vmem:[#allocation7] sm:$0xff] %v104_v11 }
  0x3a   :  { %s222_s21 = scalar_lea.vmem %s122_s10, 128  ;;  %p227_p11 = scmp.lt.s32.totalorder %s122_s10, %s122_s10 }
  0x3b   :  { %p223_p10 = scmp.ne.s32.totalorder %s122_s10, %s222_s21  ;;  %p228_p12 = scmp.lt.s32.totalorder %s222_s21, %s222_s21 }
  0x3d   :  { %p229_p13 = por %p228_p12, %p227_p11 }
  0x3f   :  { %p230_p0 = pnand %p229_p13, %p223_p10 }
  0x41   :  { %233 = shalt.err (!%p230_p0)
}
  0x42   :  { %s234_s24 = scalar_lea.hbm %s327_s2, 128 }
  0x43   :  { %p235_p1 = scmp.ne.s32.totalorder %s327_s2, %s234_s24  ;;  %p238_p2 = scmp.lt.u32.totalorder %s234_s24, %s327_s2 }
  0x45   :  { %p240_p3 = pnand %p238_p2, %p235_p1 }
  0x47   :  { %243 = shalt.err (!%p240_p3)
}
  0x48   :  { %124 = dma.vmem_to_hbm [thread:$0]  %s122_s10, 128, %s327_s2, [#allocation4]  }
  0x49   :  { %248 = dma.done.wait [#allocation4], 128  }
  0x4a   :  { %249 = vsyncadd [#allocation4], 4294967168 }
  0x4b   :  { %250 = dma.done.wait [#allocation9], 128  }
  0x4c   :  { %251 = vsyncadd [#allocation9], 4294967168 }
  0x4d   :  { %141 = vsyncpa [#allocation3], 1 }
  0x4e   :  { %142 = vsyncpa [#allocation6], 1 }
  0x4f   :  { %143 = vsyncpa [#allocation4], 1 }
  0x50   :  { %144 = vsyncpa [#allocation9], 1 }

</bundles_post_ra>
